<compile_context>
chip_gen: v5e
topology: v5e:2x2
jax: 0.10.0
libtpu: 0.0.40
codegen_flags: <defaults>
</compile_context>

<pallas_src>
import jax
import jax.numpy as jnp
from jax.experimental import pallas as pl
from jax.experimental.pallas import tpu as pltpu


TASK_OBS_DIM = 4
SCAN_DIM = 228
IN_DIM = TASK_OBS_DIM + SCAN_DIM     # 232
HIDDEN = 64
PACKED_HIDDEN = 2 * HIDDEN           # 128: value hidden | action hidden
OUT_LANES = 128                      # lane-dense output: [a0, a1, v, 0, ..., 0]


def _fused_heads_kernel(task_ref, scan_ref,
                        w1t_ref, w1s_ref, b1_ref,
                        w2_ref, b2_ref,
                        out_ref):
    """Both FC heads fused: one 128-wide layer-1 matmul, one packed layer-2 matmul."""
    # Layer 1: x @ W1_packed, with W1 split by input rows so no concat is needed.
    # Both operands stream through the bf16 MXU with f32 accumulation.
    h = jnp.dot(task_ref[...].astype(jnp.bfloat16), w1t_ref[...],
                preferred_element_type=jnp.float32)
    h = h + jnp.dot(scan_ref[...].astype(jnp.bfloat16), w1s_ref[...],
                    preferred_element_type=jnp.float32)
    h = jnp.tanh(h + b1_ref[...])                       # (TB, 128) f32

    # Layer 2: packed (128, 128) weight. Zeros outside the head blocks keep the
    # two heads independent; padded output lanes come out as tanh(0) = 0.
    y = jnp.dot(h.astype(jnp.bfloat16), w2_ref[...],
                preferred_element_type=jnp.float32) + b2_ref[...]
    # bf16 tanh + bf16 store: halves EUP pushes (v6e/v7x bf16 EUP) and halves
    # the HBM writeback; store stays lane-dense (128 lanes, no vst.msk).
    out_ref[...] = jnp.tanh(y.astype(jnp.bfloat16))     # (TB, 128) bf16


def _pick_batch_tile(batch):
    # Max 2048 rows: double-buffered f32 scan tiles + bf16 output ~5 MiB, far
    # under the v5e 16 MiB scoped-VMEM default and v7x's 64 MiB physical VMEM.
    # Halve until the grid has >= 2 steps so "parallel" batch sharding can use
    # both v7x TensorCores (no-op on single-TC v5e/v6e). Floor at 8 sublanes.
    tb = 2048
    while tb > 8 and pl.cdiv(batch, tb) < 2:
        tb //= 2
    return tb


def igibson_ppo_forward(task_obs, scan, packed):
    """Forward pass. Returns (action_out (B, 2) f32, value_out (B,) f32)."""
    B = task_obs.shape[0]
    task = task_obs.astype(jnp.float32).reshape(B, -1)   # (B, 4)
    scan_f = scan.astype(jnp.float32).reshape(B, -1)     # (B, 228)

    tb = _pick_batch_tile(B)
    grid = (pl.cdiv(B, tb),)                             # ragged last block; no jnp.pad

    weight_bytes = (TASK_OBS_DIM * PACKED_HIDDEN * 2        # w1_task bf16
                    + SCAN_DIM * PACKED_HIDDEN * 2           # w1_scan bf16
                    + PACKED_HIDDEN * OUT_LANES * 2          # w2 bf16
                    + 2 * OUT_LANES * 4)                     # biases f32
    cost = pl.CostEstimate(
        flops=2 * B * (IN_DIM * PACKED_HIDDEN + PACKED_HIDDEN * OUT_LANES),
        transcendentals=B * (PACKED_HIDDEN + OUT_LANES),
        bytes_accessed=B * (IN_DIM * 4 + OUT_LANES * 2) + weight_bytes,
    )

    out = pl.pallas_call(
        _fused_heads_kernel,
        out_shape=jax.ShapeDtypeStruct((B, OUT_LANES), jnp.bfloat16),
        grid_spec=pltpu.PrefetchScalarGridSpec(
            num_scalar_prefetch=0,
            grid=grid,
            in_specs=[
                pl.BlockSpec((tb, TASK_OBS_DIM), lambda i: (i, 0)),      # task rows
                pl.BlockSpec((tb, SCAN_DIM), lambda i: (i, 0)),          # scan rows
                pl.BlockSpec((TASK_OBS_DIM, PACKED_HIDDEN), lambda i: (0, 0)),
                pl.BlockSpec((SCAN_DIM, PACKED_HIDDEN), lambda i: (0, 0)),
                pl.BlockSpec((1, PACKED_HIDDEN), lambda i: (0, 0)),
                pl.BlockSpec((PACKED_HIDDEN, OUT_LANES), lambda i: (0, 0)),
                pl.BlockSpec((1, OUT_LANES), lambda i: (0, 0)),
            ],
            out_specs=pl.BlockSpec((tb, OUT_LANES), lambda i: (i, 0)),
        ),
        compiler_params=pltpu.CompilerParams(
            dimension_semantics=("parallel",),       # shards batch across v7x's 2 TCs
            vmem_limit_bytes=32 * 1024 * 1024,
        ),
        cost_estimate=cost,
    )(task, scan_f,
      packed["w1_task"], packed["w1_scan"], packed["b1"],
      packed["w2"], packed["b2"])

    # Consumers that can take the packed bf16 (B, 128) slab directly should use
    # `out` as-is; the slices below restore the module's (B,2)/(B,) f32 API and
    # now only re-read a bf16 (half-size) slab.
    action_out = out[:, 0:2].astype(jnp.float32)     # lanes 0..1
    value_out = out[:, 2].astype(jnp.float32)        # lane 2, already flattened (B,)
    return action_out, value_out


def init_params(key):
    """nn.Linear-style init, weights stored transposed as (in, out), biases (1, out)."""
    def linear(k, fan_in, fan_out):
        kw, kb = jax.random.split(k)
        bound = 1.0 / jnp.sqrt(jnp.float32(fan_in))
        w = jax.random.uniform(kw, (fan_in, fan_out), jnp.float32, -bound, bound)
        b = jax.random.uniform(kb, (1, fan_out), jnp.float32, -bound, bound)
        return w, b

    k1, k2, k3, k4 = jax.random.split(key, 4)
    w1v, b1v = linear(k1, IN_DIM, HIDDEN)
    w2v, b2v = linear(k2, HIDDEN, 1)
    w1a, b1a = linear(k3, IN_DIM, HIDDEN)
    w2a, b2a = linear(k4, HIDDEN, 2)
    return dict(w1v=w1v, b1v=b1v, w2v=w2v, b2v=b2v,
                w1a=w1a, b1a=b1a, w2a=w2a, b2a=b2a)


def pack_params(p):
    """Pack the two heads into fused/lane-dense kernel operands (done once, offline)."""
    w1 = jnp.concatenate([p["w1v"], p["w1a"]], axis=1)        # (232, 128)
    b1 = jnp.concatenate([p["b1v"], p["b1a"]], axis=1)        # (1, 128)

    w2 = jnp.zeros((PACKED_HIDDEN, OUT_LANES), jnp.float32)
    w2 = w2.at[HIDDEN:, 0:2].set(p["w2a"])                    # action -> lanes 0..1
    w2 = w2.at[:HIDDEN, 2:3].set(p["w2v"])                    # value  -> lane 2
    b2 = jnp.zeros((1, OUT_LANES), jnp.float32)
    b2 = b2.at[:, 0:2].set(p["b2a"])
    b2 = b2.at[:, 2:3].set(p["b2v"])

    return dict(
        w1_task=w1[:TASK_OBS_DIM, :].astype(jnp.bfloat16),    # (4, 128)   bf16
        w1_scan=w1[TASK_OBS_DIM:, :].astype(jnp.bfloat16),    # (228, 128) bf16
        b1=b1,                                                # (1, 128)   f32
        w2=w2.astype(jnp.bfloat16),                           # (128, 128) bf16
        b2=b2,                                                # (1, 128)   f32
    )


def reference_forward(task_obs, scan, params):
    """Pure-JAX f32 reference matching the PyTorch module semantics."""
    B = task_obs.shape[0]
    x = jnp.concatenate([task_obs.astype(jnp.float32).reshape(B, -1),
                         scan.astype(jnp.float32).reshape(B, -1)], axis=1)
    hv = jnp.tanh(x @ params["w1v"] + params["b1v"])
    v = jnp.tanh(hv @ params["w2v"] + params["b2v"]).reshape(-1)
    ha = jnp.tanh(x @ params["w1a"] + params["b1a"])
    a = jnp.tanh(ha @ params["w2a"] + params["b2a"])
    return a, v


if __name__ == "__main__":
    key = jax.random.PRNGKey(0)
    k_obs, k_scan, k_params = jax.random.split(key, 3)

    B = 8
    task_obs = jax.random.normal(k_obs, (B, TASK_OBS_DIM), jnp.float32)
    scan = jax.random.normal(k_scan, (B, SCAN_DIM), jnp.float32)
    params = init_params(k_params)
    packed = pack_params(params)

    fwd = jax.jit(igibson_ppo_forward)
    action_out, value_out = fwd(task_obs, scan, packed)
    action_out = jax.block_until_ready(action_out)
    value_out = jax.block_until_ready(value_out)

    ref_action, ref_value = reference_forward(task_obs, scan, params)

    assert action_out.shape == (B, 2), action_out.shape
    assert value_out.shape == (B,), value_out.shape
    # bf16 matmul operands / bf16 output (f32 accumulation) -> relaxed tolerance
    # vs the pure-f32 reference.
    assert jnp.allclose(action_out, ref_action, atol=2e-2, rtol=1e-2)
    assert jnp.allclose(value_out, ref_value, atol=2e-2, rtol=1e-2)

    print("KERNEL_OK")
</pallas_src>

<mosaic_0001>
module attributes {stable_mosaic.version = 11 : i64} {
  func.func @_fused_heads_kernel(%arg0: i32, %arg1: memref<8x4xf32, #tpu.memory_space<vmem>>, %arg2: memref<8x228xf32, #tpu.memory_space<vmem>>, %arg3: memref<4x128xbf16, #tpu.memory_space<vmem>>, %arg4: memref<228x128xbf16, #tpu.memory_space<vmem>>, %arg5: memref<1x128xf32, #tpu.memory_space<vmem>>, %arg6: memref<128x128xbf16, #tpu.memory_space<vmem>>, %arg7: memref<1x128xf32, #tpu.memory_space<vmem>>, %arg8: memref<8x128xbf16, #tpu.memory_space<vmem>>) attributes {dimension_semantics = [#tpu.dimension_semantics<parallel>], iteration_bounds = array<i64: 1>, scalar_prefetch = 0 : i64, scratch_operands = 0 : i64, tpu.core_type = #tpu.core_type<tc>, window_params = [{transform_indices = @transform_0, window_bounds = array<i64: 8, 4>}, {transform_indices = @transform_1, window_bounds = array<i64: 8, 228>}, {pipeline_mode = #tpu.pipeline_mode<synchronous>, transform_indices = @transform_2, window_bounds = array<i64: 4, 128>}, {pipeline_mode = #tpu.pipeline_mode<synchronous>, transform_indices = @transform_3, window_bounds = array<i64: 228, 128>}, {pipeline_mode = #tpu.pipeline_mode<synchronous>, transform_indices = @transform_4, window_bounds = array<i64: 1, 128>}, {pipeline_mode = #tpu.pipeline_mode<synchronous>, transform_indices = @transform_5, window_bounds = array<i64: 128, 128>}, {pipeline_mode = #tpu.pipeline_mode<synchronous>, transform_indices = @transform_6, window_bounds = array<i64: 1, 128>}, {transform_indices = @transform_7, window_bounds = array<i64: 8, 128>}]} {
    %c0 = arith.constant 0 : index
    %c0_0 = arith.constant 0 : index
    %0 = vector.load %arg1[%c0, %c0_0] : memref<8x4xf32, #tpu.memory_space<vmem>>, vector<8x4xf32>
    %1 = arith.truncf %0 : vector<8x4xf32> to vector<8x4xbf16>
    %c0_1 = arith.constant 0 : index
    %c0_2 = arith.constant 0 : index
    %2 = vector.load %arg3[%c0_1, %c0_2] : memref<4x128xbf16, #tpu.memory_space<vmem>>, vector<4x128xbf16>
    %cst = arith.constant dense<0.000000e+00> : vector<8x128xf32>
    %3 = tpu.matmul %1, %2, %cst {dimension_numbers = #tpu.dot_dimension_numbers<[1], [0], [0], [1], [0, 0, 1, 1], [], []>} : vector<8x4xbf16>, vector<4x128xbf16>, vector<8x128xf32> -> vector<8x128xf32>
    %c0_3 = arith.constant 0 : index
    %c0_4 = arith.constant 0 : index
    %4 = vector.load %arg2[%c0_3, %c0_4] : memref<8x228xf32, #tpu.memory_space<vmem>>, vector<8x228xf32>
    %5 = arith.truncf %4 : vector<8x228xf32> to vector<8x228xbf16>
    %c0_5 = arith.constant 0 : index
    %c0_6 = arith.constant 0 : index
    %6 = vector.load %arg4[%c0_5, %c0_6] : memref<228x128xbf16, #tpu.memory_space<vmem>>, vector<228x128xbf16>
    %cst_7 = arith.constant dense<0.000000e+00> : vector<8x128xf32>
    %7 = tpu.matmul %5, %6, %cst_7 {dimension_numbers = #tpu.dot_dimension_numbers<[1], [0], [0], [1], [0, 0, 1, 1], [], []>} : vector<8x228xbf16>, vector<228x128xbf16>, vector<8x128xf32> -> vector<8x128xf32>
    %8 = arith.addf %3, %7 : vector<8x128xf32>
    %c0_8 = arith.constant 0 : index
    %c0_9 = arith.constant 0 : index
    %9 = vector.load %arg5[%c0_8, %c0_9] : memref<1x128xf32, #tpu.memory_space<vmem>>, vector<1x128xf32>
    %10 = vector.broadcast %9 : vector<1x128xf32> to vector<8x128xf32>
    %11 = arith.addf %8, %10 : vector<8x128xf32>
    %12 = math.tanh %11 : vector<8x128xf32>
    %13 = arith.truncf %12 : vector<8x128xf32> to vector<8x128xbf16>
    %c0_10 = arith.constant 0 : index
    %c0_11 = arith.constant 0 : index
    %14 = vector.load %arg6[%c0_10, %c0_11] : memref<128x128xbf16, #tpu.memory_space<vmem>>, vector<128x128xbf16>
    %cst_12 = arith.constant dense<0.000000e+00> : vector<8x128xf32>
    %15 = tpu.matmul %13, %14, %cst_12 {dimension_numbers = #tpu.dot_dimension_numbers<[1], [0], [0], [1], [0, 0, 1, 1], [], []>} : vector<8x128xbf16>, vector<128x128xbf16>, vector<8x128xf32> -> vector<8x128xf32>
    %c0_13 = arith.constant 0 : index
    %c0_14 = arith.constant 0 : index
    %16 = vector.load %arg7[%c0_13, %c0_14] : memref<1x128xf32, #tpu.memory_space<vmem>>, vector<1x128xf32>
    %17 = vector.broadcast %16 : vector<1x128xf32> to vector<8x128xf32>
    %18 = arith.addf %15, %17 : vector<8x128xf32>
    %19 = arith.truncf %18 : vector<8x128xf32> to vector<8x128xbf16>
    %20 = math.tanh %19 : vector<8x128xbf16>
    %c0_15 = arith.constant 0 : index
    %c0_16 = arith.constant 0 : index
    %21 = vector.load %arg8[%c0_15, %c0_16] : memref<8x128xbf16, #tpu.memory_space<vmem>>, vector<8x128xbf16>
    tpu.vector_store %arg8[%c0_15, %c0_16], %20 {strides = array<i32>} : memref<8x128xbf16, #tpu.memory_space<vmem>>, vector<8x128xbf16>,
    return
  }
  func.func @transform_0(%arg0: i32) -> (i32, i32) {
    %c0_i32 = arith.constant 0 : i32
    %c0_i32_0 = arith.constant 0 : i32
    return %arg0, %c0_i32 : i32, i32
  }
  func.func @transform_1(%arg0: i32) -> (i32, i32) {
    %c0_i32 = arith.constant 0 : i32
    %c0_i32_0 = arith.constant 0 : i32
    return %arg0, %c0_i32 : i32, i32
  }
  func.func @transform_2(%arg0: i32) -> (i32, i32) {
    %c0_i32 = arith.constant 0 : i32
    %c0_i32_0 = arith.constant 0 : i32
    %c0_i32_1 = arith.constant 0 : i32
    return %c0_i32, %c0_i32_0 : i32, i32
  }
  func.func @transform_3(%arg0: i32) -> (i32, i32) {
    %c0_i32 = arith.constant 0 : i32
    %c0_i32_0 = arith.constant 0 : i32
    %c0_i32_1 = arith.constant 0 : i32
    return %c0_i32, %c0_i32_0 : i32, i32
  }
  func.func @transform_4(%arg0: i32) -> (i32, i32) {
    %c0_i32 = arith.constant 0 : i32
    %c0_i32_0 = arith.constant 0 : i32
    %c0_i32_1 = arith.constant 0 : i32
    return %c0_i32, %c0_i32_0 : i32, i32
  }
  func.func @transform_5(%arg0: i32) -> (i32, i32) {
    %c0_i32 = arith.constant 0 : i32
    %c0_i32_0 = arith.constant 0 : i32
    %c0_i32_1 = arith.constant 0 : i32
    return %c0_i32, %c0_i32_0 : i32, i32
  }
  func.func @transform_6(%arg0: i32) -> (i32, i32) {
    %c0_i32 = arith.constant 0 : i32
    %c0_i32_0 = arith.constant 0 : i32
    %c0_i32_1 = arith.constant 0 : i32
    return %c0_i32, %c0_i32_0 : i32, i32
  }
  func.func @transform_7(%arg0: i32) -> (i32, i32) {
    %c0_i32 = arith.constant 0 : i32
    %c0_i32_0 = arith.constant 0 : i32
    return %arg0, %c0_i32 : i32, i32
  }
}

</mosaic_0001>

<bundles_post_ra>
// kernel: igibson_ppo_forward.1
= control target key start
LH: loop header
LB: loop body
LE: loop exit
PB: predicated region body
PF: predicated region fallthrough
CT: control target
= control target key end

     0   :  { %12 = vsyncpa [#allocation3], 0  ;;  %s616_s0 = inlined_call_operand.vmem [shape: f32[8,4], index: 0, kind: input, shape index: {}]   ;;  %s617_s1 = inlined_call_operand.hbm [shape: f32[8,228], index: 1, kind: input, shape index: {}]   ;;  %s618_s2 = inlined_call_operand.vmem [shape: bf16[4,128], index: 2, kind: input, shape index: {}]   ;;  %s619_s3 = inlined_call_operand.hbm [shape: bf16[228,128], index: 3, kind: input, shape index: {}]   ;;  %s620_s4 = inlined_call_operand.vmem [shape: f32[1,128], index: 4, kind: input, shape index: {}]   ;;  %s621_s5 = inlined_call_operand.hbm [shape: bf16[128,128], index: 5, kind: input, shape index: {}]   ;;  %s622_s6 = inlined_call_operand.vmem [shape: f32[1,128], index: 6, kind: input, shape index: {}]   ;;  %s623_s7 = inlined_call_operand.vmem [shape: bf16[8,128], index: 7, kind: output, shape index: {}]  }
   0x1   :  { %13 = vsyncpa [#allocation5], 0  ;;  %s33_s26 = sshll.u32 %s619_s3, 4  ;;  %s547_s27 = smov [#allocation4]   ;;  %s34_s26 = int_to_ptr.hbm [resolvable:$true] %s33_s26 }
   0x2   :  { %s35_s28 = sshll.u32 %s547_s27, 4  ;;  %s21_s8 = sshll.u32 %s617_s1, 4  ;;  %s36_s28 = int_to_ptr.vmem [resolvable:$true] %s35_s28  ;;  %s22_s8 = int_to_ptr.hbm [resolvable:$true] %s21_s8 }
   0x3   :  { %s548_s9 = smov 64   ;;  %s549_s10 = smov 4  }
   0x4   :  { %41 = dma.hbm_to_vmem [thread:$0]  %s34_s26, 1856, %s36_s28, [#allocation5], %s548_s9, %s548_s9, %s549_s10  }
   0x5   :  { %s550_s11 = smov [#allocation2]   ;;  %s48_s15 = sshll.u32 %s621_s5, 4  ;;  %s49_s15 = int_to_ptr.hbm [resolvable:$true] %s48_s15 }
   0x6   :  { %s23_s12 = sshll.u32 %s550_s11, 4  ;;  %s551_s3 = smov [#allocation6]   ;;  %s24_s12 = int_to_ptr.vmem [resolvable:$true] %s23_s12 }
   0x7   :  { %26 = dma.hbm_to_vmem [thread:$0]  %s22_s8, 256, %s24_s12, [#allocation3]  }
   0x8   :  { %s50_s16 = sshll.u32 %s551_s3, 4  ;;  %s51_s16 = int_to_ptr.vmem [resolvable:$true] %s50_s16 }
   0x9   :  { %56 = dma.hbm_to_vmem [thread:$0]  %s49_s15, 1024, %s51_s16, [#allocation5], %s548_s9, %s548_s9, %s549_s10  }
   0xa   :  { %543 = dma.done.wait [#allocation3], 256  }
   0xb   :  { %544 = vsyncadd [#allocation3], 4294967040 }
   0xc   :  { %545 = dma.done.wait [#allocation5], 2880  }
   0xd   :  { %546 = vsyncadd [#allocation5], 4294964416  ;;  %v445_v0 = vld [vmem:[#allocation4 + $0x38] sm:$0xff]  ;;  %v107_v1 = vld [vmem:[#allocation4 + $0x70] sm:$0x3]  ;;  %vm199_vm0 = vcmask 1041408  }
   0xe   :  { %v165_v2 = vunpack.c.l.b16 %v107_v1  ;;  %203 = vmatpush.bf16.msra.mxu0 %v445_v0  ;;  %v444_v3 = vld [vmem:[#allocation4 + $0x30] sm:$0xff]  ;;  %vm229_vm1 = vcmask 31744   ;;  %v451_v10 = vld [vmem:[#allocation4 + $0x68] sm:$0xff]  ;;  %v450_v14 = vld [vmem:[#allocation4 + $0x60] sm:$0xff]  ;;  %vm195_vm2 = vcmask 818176  }
   0xf   :  { %v74_v5 = vld [vmem:[%s618_s2] sm:$0x3]  ;;  %v443_v11 = vld [vmem:[#allocation4 + $0x28] sm:$0xff]  ;;  %v442_v15 = vld [vmem:[#allocation4 + $0x20] sm:$0xff] }
  0x10   :  { %v180_v4 = vpack.c.b16 %v165_v2, %v165_v2  ;;  %v72_v6 = vld [vmem:[%s616_s0] sm:$0xff]  ;;  %v234_v7 = vsel %vm199_vm0, %v74_v5, 0  ;;  %v458_v13 = vld [vmem:[#allocation6 + $0x30] sm:$0xff]  ;;  %v457_v16 = vld [vmem:[#allocation6 + $0x28] sm:$0xff] }
  0x11   :  { %v73_v8 = vpack.c.bf16 %v72_v6, %v72_v6  ;;  %243 = vmatpush.bf16.msra.mxu2 %v234_v7  ;;  %v459_v12 = vld [vmem:[#allocation6 + $0x38] sm:$0xff]  ;;  %v449_v17 = vld [vmem:[#allocation4 + $0x58] sm:$0xff]  ;;  %v446_v23 = vld [vmem:[#allocation4 + $0x40] sm:$0xff] }
  0x12   :  { %v201_v9 = vsel %vm199_vm0, %v180_v4, 0  ;;  %204 = vmatpush.bf16.msra.mxu0 %v444_v3  ;;  %324 = vmatpush.bf16.msra.mxu3 %v459_v12  ;;  %v441_v18 = vld [vmem:[#allocation4 + $0x18] sm:$0xff]  ;;  %v448_v19 = vld [vmem:[#allocation4 + $0x50] sm:$0xff]  ;;  %v447_v21 = vld [vmem:[#allocation4 + $0x48] sm:$0xff] }
  0x13   :  { %217 = vmatpush.bf16.msra.mxu1 %v201_v9  ;;  %v440_v20 = vld [vmem:[#allocation4 + $0x10] sm:$0xff]  ;;  %v439_v22 = vld [vmem:[#allocation4 + $0x8] sm:$0xff]  ;;  %v438_v24 = vld [vmem:[#allocation4] sm:$0xff] }
  0x14   :  { %405 = vmatmul.msk.bf16.vlgmr.msra.gmra.mxu2 %vm229_vm1, %v73_v8  ;;  %v76_v25 = vld [vmem:[#allocation2 + $0x8] sm:$0xff]  ;;  %v75_v26 = vld [vmem:[#allocation2] sm:$0xff]  ;;  %v454_v31 = vld [vmem:[#allocation6 + $0x10] sm:$0xff] }
  0x15   :  { %v78_v27 = vpack.c.bf16 %v76_v25, %v76_v25  ;;  %v77_v28 = vpack.c.bf16 %v75_v26, %v75_v26  ;;  %v456_v29 = vld [vmem:[#allocation6 + $0x20] sm:$0xff]  ;;  %v455_v30 = vld [vmem:[#allocation6 + $0x18] sm:$0xff]  ;;  %v453_v32 = vld [vmem:[#allocation6 + $0x8] sm:$0xff] }
  0x16   :  { %205 = vmatpush.bf16.msra.mxu0 %v443_v11  ;;  %325 = vmatpush.bf16.msra.mxu3 %v458_v13  ;;  %v452_v33 = vld [vmem:[#allocation6] sm:$0xff]  ;;  %v465_v39 = vld [vmem:[%s620_s4] ss:$0 sm:$0xff] }
  0x17   :  { %218 = vmatpush.bf16.msra.mxu1 %v451_v10  ;;  %v466_v46 = vld [vmem:[%s622_s6] ss:$0 sm:$0xff] }
  0x1a   :  { %206 = vmatpush.bf16.msra.mxu0 %v442_v15  ;;  %326 = vmatpush.bf16.msra.mxu3 %v457_v16 }
  0x1b   :  { %219 = vmatpush.bf16.msra.mxu1 %v450_v14 }
  0x1e   :  { %207 = vmatpush.bf16.msra.mxu0 %v441_v18  ;;  %327 = vmatpush.bf16.msra.mxu3 %v456_v29 }
  0x1f   :  { %220 = vmatpush.bf16.msra.mxu1 %v449_v17 }
  0x22   :  { %208 = vmatpush.bf16.msra.mxu0 %v440_v20  ;;  %328 = vmatpush.bf16.msra.mxu3 %v455_v30 }
  0x23   :  { %221 = vmatpush.bf16.msra.mxu1 %v448_v19 }
  0x26   :  { %209 = vmatpush.bf16.msra.mxu0 %v439_v22  ;;  %329 = vmatpush.bf16.msra.mxu3 %v454_v31 }
  0x27   :  { %222 = vmatpush.bf16.msra.mxu1 %v447_v21 }
  0x2a   :  { %210 = vmatpush.bf16.msra.mxu0 %v438_v24  ;;  %330 = vmatpush.bf16.msra.mxu3 %v453_v32 }
  0x2b   :  { %223 = vmatpush.bf16.msra.mxu1 %v446_v23 }
  0x2d   :  { %211 = vmatmul.bf16.vlgmr.msra.gmra.mxu0 %v77_v28 }
  0x2e   :  { %404 = vmatmul.msk.bf16.vlgmr.msra.gmra.mxu1 %vm195_vm2, %v78_v27  ;;  %331 = vmatpush.bf16.msra.mxu3 %v452_v33 }
  0x97   :  { %v245_v34 = vpop.f32.mrf.mxu2 }
  0x9f   :  { %v247_v35 = vpop.f32.mrf.mxu2 }
  0xaa   :  { %v212_v37 = vpop.f32.mrf.mxu0 }
  0xab   :  { %v225_v36 = vpop.f32.mrf.mxu1 }
  0xac   :  { %v226_v38 = vadd.f32 %v225_v36, %v212_v37 }
  0xae   :  { %v246_v40 = vadd.f32 %v245_v34, %v226_v38 }
  0xb0   :  { %v253_v41 = vadd.f32 %v465_v39, %v246_v40 }
  0xb2   :  { %467 = vtanh.f32 %v253_v41  ;;  %v214_v43 = vpop.f32.mrf.mxu0 }
  0xb3   :  { %v227_v42 = vpop.f32.mrf.mxu1 }
  0xb8   :  { %v468_v44 = vpop.eup %467 }
  0xb9   :  { %v255_v45 = vpack.c.bf16 %v468_v44, %v468_v44 }
  0xbb   :  { %332 = vmatmul.bf16.vlgmr.msra.gmra.mxu3 %v255_v45 }
 0x13e   :  { %v333_v47 = vpop.f32.mrf.mxu3 }
 0x13f   :  { %v334_v48 = vadd.f32 %v466_v46, %v333_v47 }
 0x141   :  { %v337_v49 = vpack.c.bf16 %v334_v48, %v334_v48 }
 0x143   :  { %v338_v50 = vunpack.c.l.bf16 %v337_v49 }
 0x145   :  { %469 = vtanh.f32 %v338_v50 }
 0x146   :  { %v335_v51 = vpop.f32.mrf.mxu3 }
 0x14b   :  { %v470_v52 = vpop.eup %469 }
 0x14c   :  { %v340_v53 = vpack.c.bf16 %v470_v52, %v470_v52 }
 0x14e   :  { %341 = vst [vmem:[%s623_s7] sm:$0xf] %v340_v53 }
 0x14f   :  { %346 = vsyncpa [#allocation3], 1 }
 0x150   :  { %347 = vsyncpa [#allocation5], 1 }

</bundles_post_ra>
